<compile_context>
chip_gen: v6e
topology: v6e:2x2x1
jax: 0.10.0
libtpu: 0.0.40
codegen_flags: <defaults>
</compile_context>

<pallas_src>
import functools

import jax
import jax.numpy as jnp
from jax.experimental import pallas as pl
from jax.experimental.pallas import tpu as pltpu


# ---------------------------------------------------------------------------
# Kernels
# ---------------------------------------------------------------------------
def _scores_kernel(z_ref, w1_ref, b1_ref, part_ref, *, M, D):
    """Per-tile partial statistics: part[m, :] = sum_rows tanh(z_m @ W1 + b1)."""
    w1 = w1_ref[...]                                        # (D, H)
    b1 = b1_ref[...]                                        # (1, H)
    parts = []
    for m in range(M):                                      # M is small & static
        zm = z_ref[:, m * D:(m + 1) * D]                    # (tile_rows, D) lane slice
        hm = jnp.tanh(jnp.dot(zm, w1, preferred_element_type=jnp.float32) + b1)
        parts.append(jnp.sum(hm, axis=0, keepdims=True))    # (1, H)
    part_ref[...] = jnp.concatenate(parts, axis=0)          # (M, H)


def _apply_kernel(beta_ref, z_ref, out_ref, *, M, D, k):
    """out = sum_m beta[m] * z[:, m, :], with k node rows folded into lanes."""
    cols = []
    for j in range(k):
        base = j * M * D
        acc = z_ref[:, base:base + D].astype(jnp.float32) * beta_ref[0, 0]
        for m in range(1, M):
            lo = base + m * D
            acc = acc + z_ref[:, lo:lo + D].astype(jnp.float32) * beta_ref[m, 0]
        cols.append(acc)
    res = cols[0] if k == 1 else jnp.concatenate(cols, axis=1)
    out_ref[...] = res.astype(out_ref.dtype)


def _fused_kernel(z_ref, w1_ref, b1_ref, w2r_ref, out_ref, beta_ref, *, M, D, inv_n):
    """Single-call path (whole z resident in VMEM): scores, softmax, weighted sum."""
    w1 = w1_ref[...]                                        # (D, H)
    b1 = b1_ref[...]                                        # (1, H)
    w2r = w2r_ref[...]                                      # (1, H)

    scores = []
    for m in range(M):
        zm = z_ref[:, m * D:(m + 1) * D]                    # (N, D)
        hm = jnp.tanh(jnp.dot(zm, w1, preferred_element_type=jnp.float32) + b1)
        hbar = jnp.sum(hm, axis=0, keepdims=True) * inv_n   # (1, H) mean over nodes
        scores.append(jnp.sum(hbar * w2r, axis=1, keepdims=True))   # (1, 1)
    w = jnp.concatenate(scores, axis=0)                     # (M, 1)
    e = jnp.exp(w - jnp.max(w))
    beta = e / jnp.sum(e)                                   # (M, 1)
    beta_ref[...] = beta.astype(beta_ref.dtype)

    # Extract beta[m] as scalars (masked full-reduce of a tiny vector).
    midx = jax.lax.broadcasted_iota(jnp.int32, (M, 1), 0)
    acc = None
    for m in range(M):
        bm = jnp.sum(jnp.where(midx == m, beta, 0.0))       # scalar
        t = z_ref[:, m * D:(m + 1) * D].astype(jnp.float32) * bm
        acc = t if acc is None else acc + t
    out_ref[...] = acc.astype(out_ref.dtype)


# ---------------------------------------------------------------------------
# Wrapper
# ---------------------------------------------------------------------------
def _vmem_budget_bytes():
    """Generation-aware (tile budget, scoped vmem limit) in bytes."""
    cap = 64 * 1024 * 1024
    try:
        cap = int(getattr(pltpu.get_tpu_info(), "vmem_capacity_bytes", cap))
    except Exception:
        pass
    if cap >= 100 * 1024 * 1024:                  # v5e / v6e: 128 MiB physical
        return 40 * 1024 * 1024, 64 * 1024 * 1024
    return 20 * 1024 * 1024, 32 * 1024 * 1024     # v7x: 64 MiB physical


def semantic_attention(z, w1, b1, w2, *, tile_rows=None, fuse=None):
    """z: (N, M, D).  Returns (out (N, D) float32, beta (M, 1) float32)."""
    N, M, D = z.shape
    H = w1.shape[1]
    itemsize = jnp.dtype(z.dtype).itemsize
    out_dtype = jnp.promote_types(z.dtype, jnp.float32)
    w2_row = w2.reshape(1, H)

    budget, vmem_limit = _vmem_budget_bytes()

    # ----------------- fused single-kernel path (z resident) -----------------
    z_bytes = N * M * D * itemsize
    fits = (z_bytes + N * D * 4 + N * H * 4) <= budget // 2
    if fuse is None:
        fuse = fits
    if fuse and fits:
        out, beta = pl.pallas_call(
            functools.partial(_fused_kernel, M=M, D=D, inv_n=1.0 / N),
            out_shape=(jax.ShapeDtypeStruct((N, D), out_dtype),
                       jax.ShapeDtypeStruct((M, 1), jnp.float32)),
            compiler_params=pltpu.CompilerParams(vmem_limit_bytes=vmem_limit),
        )(z.reshape(N, M * D), w1, b1, w2_row)
        return out, beta

    # ----------------------- tiled two-pass path ------------------------------
    # Lane-fold factor for pass 2: pack k node rows into the lane axis so the
    # output block is >= 128 lanes wide (dense, unmasked stores / DMA).
    k = 128 // D if (D < 128 and 128 % D == 0) else 1
    row_align = 8 * k
    if itemsize < 4:
        row_align = max(row_align, 16)            # bf16 sublane packing

    if tile_rows is None:
        per_row = 3 * M * D * itemsize + 2 * D * 4    # pass-2 worst case (3 z bufs)
        tile_rows = budget // max(per_row, 1)
    tile_rows = int(max(row_align, min(int(tile_rows), 4096)))
    tile_rows = max(row_align, (tile_rows // row_align) * row_align)

    n_tiles = pl.cdiv(N, tile_rows)
    n_pad = n_tiles * tile_rows
    z_p = z if n_pad == N else jnp.pad(z, ((0, n_pad - N), (0, 0), (0, 0)))
    z2 = z_p.reshape(n_pad, M * D)                # lane-dense 2-D view (free)

    # ---- pass 1: per-tile partial sums of tanh(z W1 + b1), grouped by m -----
    partials = pl.pallas_call(
        functools.partial(_scores_kernel, M=M, D=D),
        out_shape=jax.ShapeDtypeStruct((n_tiles, M, H), jnp.float32),
        grid=(n_tiles,),
        in_specs=[
            pl.BlockSpec((tile_rows, M * D), lambda i: (i, 0)),
            pl.BlockSpec((D, H), lambda i: (0, 0)),
            pl.BlockSpec((1, H), lambda i: (0, 0)),
        ],
        out_specs=pl.BlockSpec((None, M, H), lambda i: (i, 0, 0)),
        compiler_params=pltpu.CompilerParams(
            dimension_semantics=("parallel",),
            vmem_limit_bytes=vmem_limit,
        ),
        cost_estimate=pl.CostEstimate(
            flops=2 * n_pad * M * D * H,
            transcendentals=n_pad * M * H,
            bytes_accessed=n_pad * M * D * itemsize + D * H * 4
                           + n_tiles * M * H * 4,
        ),
    )(z2, w1, b1)

    # Tiny finalize in plain JAX (O(M*H)): padding correction, mean over the
    # true N, W2 projection, softmax.  Each zero-padded row contributes
    # exactly tanh(b1) per metapath, so the correction is analytic and exact.
    hsum = partials.sum(axis=0)                                # (M, H)
    if n_pad != N:
        hsum = hsum - (n_pad - N) * jnp.tanh(b1)
    w = (hsum / N) @ w2                                        # (M, 1)
    beta = jax.nn.softmax(w, axis=0).astype(jnp.float32)

    # ---- pass 2: out = sum_m beta[m] * z[:, m, :]  (lane-folded rows) -------
    rows_f = n_pad // k
    tile_f = tile_rows // k
    z_f = z_p.reshape(rows_f, k * M * D)

    beta_spec = pl.BlockSpec((M, 1), lambda i: (0, 0),
                             memory_space=pltpu.MemorySpace.SMEM)
    plain_z_spec = pl.BlockSpec((tile_f, k * M * D), lambda i: (i, 0))

    def _pass2_call(z_spec):
        return pl.pallas_call(
            functools.partial(_apply_kernel, M=M, D=D, k=k),
            out_shape=jax.ShapeDtypeStruct((rows_f, k * D), out_dtype),
            grid=(n_tiles,),
            in_specs=[beta_spec, z_spec],
            out_specs=pl.BlockSpec((tile_f, k * D), lambda i: (i, 0)),
            compiler_params=pltpu.CompilerParams(
                dimension_semantics=("parallel",),
                vmem_limit_bytes=vmem_limit,
            ),
            cost_estimate=pl.CostEstimate(
                flops=2 * n_pad * M * D,
                transcendentals=0,
                bytes_accessed=n_pad * M * D * itemsize + n_pad * D * 4 + M * 4,
            ),
        )(beta, z_f)

    out_f = None
    if n_tiles >= 3:
        # Pass 2 has near-zero compute per byte; 3-deep z pipelining hides DMA
        # issue latency.  Fall back to the default depth if unsupported.
        try:
            out_f = _pass2_call(
                pl.BlockSpec((tile_f, k * M * D), lambda i: (i, 0),
                             pipeline_mode=pl.Buffered(3)))
        except Exception:
            out_f = None
    if out_f is None:
        out_f = _pass2_call(plain_z_spec)

    out = out_f.reshape(n_pad, D)[:N]
    return out, beta


# ---------------------------------------------------------------------------
# Reference + demo
# ---------------------------------------------------------------------------
def _reference(z, w1, b1, w2):
    proj = jnp.tanh(z @ w1 + b1) @ w2             # (N, M, 1)
    w = proj.mean(0)                              # (M, 1)
    beta = jax.nn.softmax(w, axis=0)              # (M, 1)
    out = (beta[None, :, :] * z).sum(1)           # (N, D)
    return out, beta


if __name__ == "__main__":
    # Small, module-consistent shapes: N nodes, M metapaths, D=in_size, H=hidden.
    N, M, D, H = 80, 4, 32, 32

    key = jax.random.PRNGKey(0)
    kz, k1, kb, k2 = jax.random.split(key, 4)
    z = jax.random.normal(kz, (N, M, D), dtype=jnp.float32)
    w1 = jax.random.normal(k1, (D, H), dtype=jnp.float32) * 0.1
    b1 = jax.random.normal(kb, (1, H), dtype=jnp.float32) * 0.1
    w2 = jax.random.normal(k2, (H, 1), dtype=jnp.float32) * 0.1

    ref_out, ref_beta = _reference(z, w1, b1, w2)

    # Fused single-kernel path (auto for small z).
    out1, beta1 = semantic_attention(z, w1, b1, w2)
    jax.block_until_ready((out1, beta1))
    assert out1.shape == (N, D) and beta1.shape == (M, 1)
    assert jnp.allclose(out1, ref_out, atol=1e-5, rtol=1e-5)
    assert jnp.allclose(beta1, ref_beta, atol=1e-5, rtol=1e-5)

    # Tiled two-pass path: multi-tile grid, padded tail (analytic correction),
    # lane-folded output, and deeper pipelining on the streaming pass.
    out2, beta2 = semantic_attention(z, w1, b1, w2, tile_rows=32, fuse=False)
    jax.block_until_ready((out2, beta2))
    assert out2.shape == (N, D) and beta2.shape == (M, 1)
    assert jnp.allclose(out2, ref_out, atol=1e-5, rtol=1e-5)
    assert jnp.allclose(beta2, ref_beta, atol=1e-5, rtol=1e-5)

    print("KERNEL_OK")
</pallas_src>

<mosaic_0001>
module attributes {stable_mosaic.version = 11 : i64} {
  func.func @_fused_kernel(%arg0: memref<80x128xf32, #tpu.memory_space<vmem>>, %arg1: memref<32x32xf32, #tpu.memory_space<vmem>>, %arg2: memref<1x32xf32, #tpu.memory_space<vmem>>, %arg3: memref<1x32xf32, #tpu.memory_space<vmem>>, %arg4: memref<80x32xf32, #tpu.memory_space<vmem>>, %arg5: memref<4x1xf32, #tpu.memory_space<vmem>>) attributes {dimension_semantics = [], scalar_prefetch = 0 : i64, scratch_operands = 0 : i64, tpu.core_type = #tpu.core_type<tc>} {
    %c0 = arith.constant 0 : index
    %c0_0 = arith.constant 0 : index
    %0 = vector.load %arg1[%c0, %c0_0] : memref<32x32xf32, #tpu.memory_space<vmem>>, vector<32x32xf32>
    %c0_1 = arith.constant 0 : index
    %c0_2 = arith.constant 0 : index
    %1 = vector.load %arg2[%c0_1, %c0_2] : memref<1x32xf32, #tpu.memory_space<vmem>>, vector<1x32xf32>
    %c0_3 = arith.constant 0 : index
    %c0_4 = arith.constant 0 : index
    %2 = vector.load %arg3[%c0_3, %c0_4] : memref<1x32xf32, #tpu.memory_space<vmem>>, vector<1x32xf32>
    %c0_5 = arith.constant 0 : index
    %c0_6 = arith.constant 0 : index
    %3 = vector.load %arg0[%c0_5, %c0_6] : memref<80x128xf32, #tpu.memory_space<vmem>>, vector<80x32xf32>
    %cst = arith.constant dense<0.000000e+00> : vector<80x32xf32>
    %4 = tpu.matmul %3, %0, %cst {dimension_numbers = #tpu.dot_dimension_numbers<[1], [0], [0], [1], [0, 0, 1, 1], [], []>} : vector<80x32xf32>, vector<32x32xf32>, vector<80x32xf32> -> vector<80x32xf32>
    %5 = vector.broadcast %1 : vector<1x32xf32> to vector<80x32xf32>
    %6 = arith.addf %4, %5 : vector<80x32xf32>
    %7 = math.tanh %6 : vector<80x32xf32>
    %cst_7 = arith.constant dense<0.000000e+00> : vector<32xf32>
    %8 = vector.multi_reduction <add>, %7, %cst_7 [0] : vector<80x32xf32> to vector<32xf32>
    %9 = vector.shape_cast %8 : vector<32xf32> to vector<1x32xf32>
    %cst_8 = arith.constant 1.250000e-02 : f32
    %10 = vector.broadcast %cst_8 : f32 to vector<1x32xf32>
    %11 = arith.mulf %9, %10 : vector<1x32xf32>
    %12 = arith.mulf %11, %2 : vector<1x32xf32>
    %cst_9 = arith.constant dense<0.000000e+00> : vector<1xf32>
    %13 = vector.multi_reduction <add>, %12, %cst_9 [1] : vector<1x32xf32> to vector<1xf32>
    %14 = vector.shape_cast %13 : vector<1xf32> to vector<1x1xf32>
    %c0_10 = arith.constant 0 : index
    %c32 = arith.constant 32 : index
    %15 = vector.load %arg0[%c0_10, %c32] : memref<80x128xf32, #tpu.memory_space<vmem>>, vector<80x32xf32>
    %cst_11 = arith.constant dense<0.000000e+00> : vector<80x32xf32>
    %16 = tpu.matmul %15, %0, %cst_11 {dimension_numbers = #tpu.dot_dimension_numbers<[1], [0], [0], [1], [0, 0, 1, 1], [], []>} : vector<80x32xf32>, vector<32x32xf32>, vector<80x32xf32> -> vector<80x32xf32>
    %17 = vector.broadcast %1 : vector<1x32xf32> to vector<80x32xf32>
    %18 = arith.addf %16, %17 : vector<80x32xf32>
    %19 = math.tanh %18 : vector<80x32xf32>
    %cst_12 = arith.constant dense<0.000000e+00> : vector<32xf32>
    %20 = vector.multi_reduction <add>, %19, %cst_12 [0] : vector<80x32xf32> to vector<32xf32>
    %21 = vector.shape_cast %20 : vector<32xf32> to vector<1x32xf32>
    %cst_13 = arith.constant 1.250000e-02 : f32
    %22 = vector.broadcast %cst_13 : f32 to vector<1x32xf32>
    %23 = arith.mulf %21, %22 : vector<1x32xf32>
    %24 = arith.mulf %23, %2 : vector<1x32xf32>
    %cst_14 = arith.constant dense<0.000000e+00> : vector<1xf32>
    %25 = vector.multi_reduction <add>, %24, %cst_14 [1] : vector<1x32xf32> to vector<1xf32>
    %26 = vector.shape_cast %25 : vector<1xf32> to vector<1x1xf32>
    %c0_15 = arith.constant 0 : index
    %c64 = arith.constant 64 : index
    %27 = vector.load %arg0[%c0_15, %c64] : memref<80x128xf32, #tpu.memory_space<vmem>>, vector<80x32xf32>
    %cst_16 = arith.constant dense<0.000000e+00> : vector<80x32xf32>
    %28 = tpu.matmul %27, %0, %cst_16 {dimension_numbers = #tpu.dot_dimension_numbers<[1], [0], [0], [1], [0, 0, 1, 1], [], []>} : vector<80x32xf32>, vector<32x32xf32>, vector<80x32xf32> -> vector<80x32xf32>
    %29 = vector.broadcast %1 : vector<1x32xf32> to vector<80x32xf32>
    %30 = arith.addf %28, %29 : vector<80x32xf32>
    %31 = math.tanh %30 : vector<80x32xf32>
    %cst_17 = arith.constant dense<0.000000e+00> : vector<32xf32>
    %32 = vector.multi_reduction <add>, %31, %cst_17 [0] : vector<80x32xf32> to vector<32xf32>
    %33 = vector.shape_cast %32 : vector<32xf32> to vector<1x32xf32>
    %cst_18 = arith.constant 1.250000e-02 : f32
    %34 = vector.broadcast %cst_18 : f32 to vector<1x32xf32>
    %35 = arith.mulf %33, %34 : vector<1x32xf32>
    %36 = arith.mulf %35, %2 : vector<1x32xf32>
    %cst_19 = arith.constant dense<0.000000e+00> : vector<1xf32>
    %37 = vector.multi_reduction <add>, %36, %cst_19 [1] : vector<1x32xf32> to vector<1xf32>
    %38 = vector.shape_cast %37 : vector<1xf32> to vector<1x1xf32>
    %c0_20 = arith.constant 0 : index
    %c96 = arith.constant 96 : index
    %39 = vector.load %arg0[%c0_20, %c96] : memref<80x128xf32, #tpu.memory_space<vmem>>, vector<80x32xf32>
    %cst_21 = arith.constant dense<0.000000e+00> : vector<80x32xf32>
    %40 = tpu.matmul %39, %0, %cst_21 {dimension_numbers = #tpu.dot_dimension_numbers<[1], [0], [0], [1], [0, 0, 1, 1], [], []>} : vector<80x32xf32>, vector<32x32xf32>, vector<80x32xf32> -> vector<80x32xf32>
    %41 = vector.broadcast %1 : vector<1x32xf32> to vector<80x32xf32>
    %42 = arith.addf %40, %41 : vector<80x32xf32>
    %43 = math.tanh %42 : vector<80x32xf32>
    %cst_22 = arith.constant dense<0.000000e+00> : vector<32xf32>
    %44 = vector.multi_reduction <add>, %43, %cst_22 [0] : vector<80x32xf32> to vector<32xf32>
    %45 = vector.shape_cast %44 : vector<32xf32> to vector<1x32xf32>
    %cst_23 = arith.constant 1.250000e-02 : f32
    %46 = vector.broadcast %cst_23 : f32 to vector<1x32xf32>
    %47 = arith.mulf %45, %46 : vector<1x32xf32>
    %48 = arith.mulf %47, %2 : vector<1x32xf32>
    %cst_24 = arith.constant dense<0.000000e+00> : vector<1xf32>
    %49 = vector.multi_reduction <add>, %48, %cst_24 [1] : vector<1x32xf32> to vector<1xf32>
    %50 = vector.shape_cast %49 : vector<1xf32> to vector<1x1xf32>
    %51 = tpu.concatenate %14, %26, %38, %50 in 0 : vector<1x1xf32>, vector<1x1xf32>, vector<1x1xf32>, vector<1x1xf32> -> vector<4x1xf32>
    %52 = vector.shape_cast %51 : vector<4x1xf32> to vector<1x4x1xf32>
    %cst_25 = arith.constant dense<0xFF800000> : vector<1xf32>
    %53 = vector.multi_reduction <maximumf>, %52, %cst_25 [1, 2] : vector<1x4x1xf32> to vector<1xf32>
    %54 = vector.shape_cast %53 : vector<1xf32> to vector<1x1x1xf32>
    %55 = vector.extract %54[0, 0, 0] : f32 from vector<1x1x1xf32>
    %56 = vector.broadcast %55 : f32 to vector<4x1xf32>
    %57 = arith.subf %51, %56 : vector<4x1xf32>
    %58 = math.exp %57 : vector<4x1xf32>
    %59 = vector.shape_cast %58 : vector<4x1xf32> to vector<1x4x1xf32>
    %cst_26 = arith.constant dense<0.000000e+00> : vector<1xf32>
    %60 = vector.multi_reduction <add>, %59, %cst_26 [1, 2] : vector<1x4x1xf32> to vector<1xf32>
    %61 = vector.shape_cast %60 : vector<1xf32> to vector<1x1x1xf32>
    %62 = vector.extract %61[0, 0, 0] : f32 from vector<1x1x1xf32>
    %63 = vector.broadcast %62 : f32 to vector<4x1xf32>
    %64 = arith.divf %58, %63 : vector<4x1xf32>
    %c0_27 = arith.constant 0 : index
    %c0_28 = arith.constant 0 : index
    %65 = vector.load %arg5[%c0_27, %c0_28] : memref<4x1xf32, #tpu.memory_space<vmem>>, vector<4x1xf32>
    tpu.vector_store %arg5[%c0_27, %c0_28], %64 {strides = array<i32>} : memref<4x1xf32, #tpu.memory_space<vmem>>, vector<4x1xf32>,
    %66 = tpu.iota {dimensions = array<i32: 0>} : vector<4x1xi32>
    %c0_i32 = arith.constant 0 : i32
    %67 = vector.broadcast %c0_i32 : i32 to vector<4x1xi32>
    %68 = arith.cmpi eq, %66, %67 : vector<4x1xi32>
    %cst_29 = arith.constant 0.000000e+00 : f32
    %69 = vector.broadcast %cst_29 : f32 to vector<4x1xf32>
    %70 = arith.select %68, %64, %69 : vector<4x1xi1>, vector<4x1xf32>
    %71 = vector.shape_cast %70 : vector<4x1xf32> to vector<1x4x1xf32>
    %cst_30 = arith.constant dense<0.000000e+00> : vector<1xf32>
    %72 = vector.multi_reduction <add>, %71, %cst_30 [1, 2] : vector<1x4x1xf32> to vector<1xf32>
    %73 = vector.shape_cast %72 : vector<1xf32> to vector<1x1x1xf32>
    %74 = vector.extract %73[0, 0, 0] : f32 from vector<1x1x1xf32>
    %c0_31 = arith.constant 0 : index
    %c0_32 = arith.constant 0 : index
    %75 = vector.load %arg0[%c0_31, %c0_32] : memref<80x128xf32, #tpu.memory_space<vmem>>, vector<80x32xf32>
    %76 = vector.broadcast %74 : f32 to vector<80x32xf32>
    %77 = arith.mulf %75, %76 : vector<80x32xf32>
    %c1_i32 = arith.constant 1 : i32
    %78 = vector.broadcast %c1_i32 : i32 to vector<4x1xi32>
    %79 = arith.cmpi eq, %66, %78 : vector<4x1xi32>
    %cst_33 = arith.constant 0.000000e+00 : f32
    %80 = vector.broadcast %cst_33 : f32 to vector<4x1xf32>
    %81 = arith.select %79, %64, %80 : vector<4x1xi1>, vector<4x1xf32>
    %82 = vector.shape_cast %81 : vector<4x1xf32> to vector<1x4x1xf32>
    %cst_34 = arith.constant dense<0.000000e+00> : vector<1xf32>
    %83 = vector.multi_reduction <add>, %82, %cst_34 [1, 2] : vector<1x4x1xf32> to vector<1xf32>
    %84 = vector.shape_cast %83 : vector<1xf32> to vector<1x1x1xf32>
    %85 = vector.extract %84[0, 0, 0] : f32 from vector<1x1x1xf32>
    %c0_35 = arith.constant 0 : index
    %c32_36 = arith.constant 32 : index
    %86 = vector.load %arg0[%c0_35, %c32_36] : memref<80x128xf32, #tpu.memory_space<vmem>>, vector<80x32xf32>
    %87 = vector.broadcast %85 : f32 to vector<80x32xf32>
    %88 = arith.mulf %86, %87 : vector<80x32xf32>
    %89 = arith.addf %77, %88 : vector<80x32xf32>
    %c2_i32 = arith.constant 2 : i32
    %90 = vector.broadcast %c2_i32 : i32 to vector<4x1xi32>
    %91 = arith.cmpi eq, %66, %90 : vector<4x1xi32>
    %cst_37 = arith.constant 0.000000e+00 : f32
    %92 = vector.broadcast %cst_37 : f32 to vector<4x1xf32>
    %93 = arith.select %91, %64, %92 : vector<4x1xi1>, vector<4x1xf32>
    %94 = vector.shape_cast %93 : vector<4x1xf32> to vector<1x4x1xf32>
    %cst_38 = arith.constant dense<0.000000e+00> : vector<1xf32>
    %95 = vector.multi_reduction <add>, %94, %cst_38 [1, 2] : vector<1x4x1xf32> to vector<1xf32>
    %96 = vector.shape_cast %95 : vector<1xf32> to vector<1x1x1xf32>
    %97 = vector.extract %96[0, 0, 0] : f32 from vector<1x1x1xf32>
    %c0_39 = arith.constant 0 : index
    %c64_40 = arith.constant 64 : index
    %98 = vector.load %arg0[%c0_39, %c64_40] : memref<80x128xf32, #tpu.memory_space<vmem>>, vector<80x32xf32>
    %99 = vector.broadcast %97 : f32 to vector<80x32xf32>
    %100 = arith.mulf %98, %99 : vector<80x32xf32>
    %101 = arith.addf %89, %100 : vector<80x32xf32>
    %c3_i32 = arith.constant 3 : i32
    %102 = vector.broadcast %c3_i32 : i32 to vector<4x1xi32>
    %103 = arith.cmpi eq, %66, %102 : vector<4x1xi32>
    %cst_41 = arith.constant 0.000000e+00 : f32
    %104 = vector.broadcast %cst_41 : f32 to vector<4x1xf32>
    %105 = arith.select %103, %64, %104 : vector<4x1xi1>, vector<4x1xf32>
    %106 = vector.shape_cast %105 : vector<4x1xf32> to vector<1x4x1xf32>
    %cst_42 = arith.constant dense<0.000000e+00> : vector<1xf32>
    %107 = vector.multi_reduction <add>, %106, %cst_42 [1, 2] : vector<1x4x1xf32> to vector<1xf32>
    %108 = vector.shape_cast %107 : vector<1xf32> to vector<1x1x1xf32>
    %109 = vector.extract %108[0, 0, 0] : f32 from vector<1x1x1xf32>
    %c0_43 = arith.constant 0 : index
    %c96_44 = arith.constant 96 : index
    %110 = vector.load %arg0[%c0_43, %c96_44] : memref<80x128xf32, #tpu.memory_space<vmem>>, vector<80x32xf32>
    %111 = vector.broadcast %109 : f32 to vector<80x32xf32>
    %112 = arith.mulf %110, %111 : vector<80x32xf32>
    %113 = arith.addf %101, %112 : vector<80x32xf32>
    %c0_45 = arith.constant 0 : index
    %c0_46 = arith.constant 0 : index
    %114 = vector.load %arg4[%c0_45, %c0_46] : memref<80x32xf32, #tpu.memory_space<vmem>>, vector<80x32xf32>
    tpu.vector_store %arg4[%c0_45, %c0_46], %113 {strides = array<i32>} : memref<80x32xf32, #tpu.memory_space<vmem>>, vector<80x32xf32>,
    return
  }
}

</mosaic_0001>

<bundles_post_ra>
// kernel: tpu_custom_call.1
= control target key start
LH: loop header
LB: loop body
LE: loop exit
PB: predicated region body
PF: predicated region fallthrough
CT: control target
= control target key end

     0   :  { %11 = vsyncpa [#allocation3], 0  ;;  %s1920_s0 = inlined_call_operand.hbm [shape: f32[80,128], index: 0, kind: input, shape index: {}]   ;;  %s1921_s1 = inlined_call_operand.hbm [shape: f32[32,32], index: 1, kind: input, shape index: {}]   ;;  %s1922_s2 = inlined_call_operand.vmem [shape: f32[1,32], index: 2, kind: input, shape index: {}]   ;;  %s1923_s3 = inlined_call_operand.vmem [shape: f32[1,32], index: 3, kind: input, shape index: {}]   ;;  %s1924_s4 = inlined_call_operand.vmem [shape: f32[80,32], index: 4, kind: output, shape index: {0}]   ;;  %s1925_s5 = inlined_call_operand.vmem [shape: f32[4,1], index: 5, kind: output, shape index: {1}]  }
   0x1   :  { %12 = vsyncpa [#allocation5], 0  ;;  %s1505_s18 = smov [#allocation2]  }
   0x2   :  { %s18_s19 = sshll.u32 %s1505_s18, 4  ;;  %s19_s19 = int_to_ptr.vmem [resolvable:$true] %s18_s19 }
   0x3   :  { %s1469_s20 = scalar_lea.vmem %s19_s19, 1280  ;;  %p1474_p1 = scmp.lt.s32.totalorder %s19_s19, %s19_s19 }
   0x4   :  { %p1470_p0 = scmp.ne.s32.totalorder %s19_s19, %s1469_s20  ;;  %p1475_p2 = scmp.lt.s32.totalorder %s1469_s20, %s1469_s20 }
   0x6   :  { %p1476_p3 = por %p1475_p2, %p1474_p1 }
   0x8   :  { %p1477_p4 = pnand %p1476_p3, %p1470_p0 }
   0xa   :  { %1480 = shalt.err (!%p1477_p4)
}
   0xb   :  { %s1506_s21 = smov 128   ;;  %s1507_s22 = smov 8  }
   0xc   :  { %24 = dma.hbm_to_vmem [thread:$0]  %s1920_s0, 1280, %s19_s19, [#allocation3], %s1506_s21, %s1506_s21, %s1507_s22  }
   0xd   :  { %s1508_s25 = smov [#allocation4]  }
   0xe   :  { %s30_s26 = sshll.u32 %s1508_s25, 4  ;;  %s31_s26 = int_to_ptr.vmem [resolvable:$true] %s30_s26 }
   0xf   :  { %s1489_s27 = scalar_lea.vmem %s31_s26, 512  ;;  %p1494_p6 = scmp.lt.s32.totalorder %s31_s26, %s31_s26 }
  0x10   :  { %p1490_p5 = scmp.ne.s32.totalorder %s31_s26, %s1489_s27  ;;  %p1495_p7 = scmp.lt.s32.totalorder %s1489_s27, %s1489_s27 }
  0x12   :  { %p1496_p8 = por %p1495_p7, %p1494_p6 }
  0x14   :  { %p1497_p9 = pnand %p1496_p8, %p1490_p5 }
  0x16   :  { %1500 = shalt.err (!%p1497_p9)
}
  0x17   :  { %36 = dma.hbm_to_vmem [thread:$0]  %s1921_s1, 512, %s31_s26, [#allocation5], %s1506_s21, %s1506_s21, %s1507_s22  }
  0x18   :  { %1501 = dma.done.wait [#allocation3], 1280  }
  0x19   :  { %1502 = vsyncadd [#allocation3], 4294966016 }
  0x1a   :  { %1503 = dma.done.wait [#allocation5], 512  }
  0x1b   :  { %1504 = vsyncadd [#allocation5], 4294966784  ;;  %vm69_vm0 = vcmask 261120   ;;  %v53_v0 = vld [vmem:[#allocation2] sm:$0xff]  ;;  %v1548_v1 = vld [vmem:[#allocation2 + $0x10] sm:$0xff]  ;;  %s1509_s0 = smov 96  }
  0x1c   :  { %256 = vrot.lane.b32.xlu0 %v53_v0, %s1509_s0  ;;  %260 = vrot.lane.b32.xlu1 %v1548_v1, %s1509_s0  ;;  %v54_v2 = vld [vmem:[#allocation2 + $0x8] sm:$0xff]  ;;  %v56_v3 = vld [vmem:[#allocation2 + $0x18] sm:$0xff]  ;;  %v1557_v5 = vld [vmem:[#allocation4 + $0x10] sm:$0xff]  ;;  %s1510_s1 = smov 64   ;;  %s1511_s30 = smov 32   ;;  %vm252_vm1 = vcmask 253952  }
  0x1d   :  { %1264 = vmatprep.mubr.msk.f32.mxu0 %vm69_vm0, %v53_v0  ;;  %v1554_v4 = vld [vmem:[#allocation4 + $0x18] sm:$0xff]  ;;  %v57_v6 = vld [vmem:[#allocation2 + $0x20] sm:$0xff]  ;;  %v1565_v8 = vld [vmem:[#allocation4 + $0x8] sm:$0xff]  ;;  %vm850_vm2 = vcmask 1040384   ;;  %vm852_vm3 = vcmask 1041408   ;;  %vm854_vm4 = vcmask 1042432  }
  0x1e   :  { %1256 = vmatprep.subr.mxu0 %v1554_v4  ;;  %1279 = vmatprep.subr.mxu1 %v1554_v4  ;;  %v58_v7 = vld [vmem:[#allocation2 + $0x28] sm:$0xff]  ;;  %v1572_v9 = vld [vmem:[#allocation4] sm:$0xff]  ;;  %v60_v11 = vld [vmem:[#allocation2 + $0x38] sm:$0xff]  ;;  %vm856_vm5 = vcmask 3072  }
  0x1f   :  { %1257 = vmatpush3.msra.mxu0 %v1554_v4  ;;  %1280 = vmatpush3.msra.mxu1 %v1554_v4  ;;  %v1574_v10 = vld [vmem:[#allocation2 + $0x30] sm:$0xff]  ;;  %v1585_v12 = vld [vmem:[#allocation2 + $0x40] sm:$0xff]  ;;  %v62_v13 = vld [vmem:[#allocation2 + $0x48] sm:$0xff] }
  0x20   :  { %258 = vrot.lane.b32.xlu0 %v54_v2, %s1509_s0  ;;  %262 = vrot.lane.b32.xlu1 %v56_v3, %s1509_s0  ;;  %v1679_v46 = vld [vmem:[%s1922_s2] ss:$0 sm:$0xff] }
  0x21   :  { %1258 = vmatprep.subr.mxu0 %v1557_v5  ;;  %1281 = vmatprep.subr.mxu1 %v1557_v5 }
  0x22   :  { %1259 = vmatpush3.msra.mxu0 %v1557_v5  ;;  %1282 = vmatpush3.msra.mxu1 %v1557_v5 }
  0x23   :  { %1260 = vmatprep.subr.mxu0 %v1565_v8  ;;  %1283 = vmatprep.subr.mxu1 %v1565_v8 }
  0x24   :  { %264 = vrot.lane.b32.xlu0 %v57_v6, %s1509_s0  ;;  %266 = vrot.lane.b32.xlu1 %v58_v7, %s1509_s0 }
  0x25   :  { %1261 = vmatpush3.msra.mxu0 %v1565_v8  ;;  %1284 = vmatpush3.msra.mxu1 %v1565_v8 }
  0x26   :  { %1262 = vmatprep.subr.mxu0 %v1572_v9  ;;  %1285 = vmatprep.subr.mxu1 %v1572_v9 }
  0x27   :  { %1263 = vmatpush3.msra.mxu0 %v1572_v9  ;;  %1286 = vmatpush3.msra.mxu1 %v1572_v9 }
  0x28   :  { %268 = vrot.lane.b32.xlu0 %v1574_v10, %s1509_s0  ;;  %270 = vrot.lane.b32.xlu1 %v60_v11, %s1509_s0 }
  0x29   :  { %1265 = vmatmul.mubr.msk.f32.vlgmr.msra.gmra.mxu0 %vm69_vm0, %v54_v2  ;;  %1302 = vmatprep.subr.mxu0 %v1554_v4 }
  0x2a   :  { %1267 = vmatprep.mubr.msk.f32.mxu0 %vm69_vm0, %v1548_v1  ;;  %1303 = vmatpush3.msra.mxu0 %v1554_v4 }
  0x2b   :  { %1304 = vmatprep.subr.mxu0 %v1557_v5  ;;  %1325 = vmatprep.subr.mxu1 %v1554_v4 }
  0x2c   :  { %272 = vrot.lane.b32.xlu0 %v1585_v12, %s1509_s0  ;;  %274 = vrot.lane.b32.xlu1 %v62_v13, %s1509_s0 }
  0x2d   :  { %1268 = vmatmul.mubr.msk.f32.gmra.mxu0 %vm69_vm0, %v56_v3 }
  0x2e   :  { %1270 = vmatprep.mubr.msk.f32.mxu0 %vm69_vm0, %v57_v6  ;;  %1305 = vmatpush3.msra.mxu0 %v1557_v5 }
  0x2f   :  { %1306 = vmatprep.subr.mxu0 %v1565_v8 }
  0x30   :  { %451 = vrot.lane.b32.xlu0 %v53_v0, %s1510_s1  ;;  %453 = vrot.lane.b32.xlu1 %v54_v2, %s1510_s1 }
  0x31   :  { %1271 = vmatmul.mubr.msk.f32.gmra.mxu0 %vm69_vm0, %v58_v7 }
  0x32   :  { %1273 = vmatprep.mubr.msk.f32.mxu0 %vm69_vm0, %v1574_v10  ;;  %1307 = vmatpush3.msra.mxu0 %v1565_v8 }
  0x33   :  { %1308 = vmatprep.subr.mxu0 %v1572_v9 }
  0x34   :  { %646 = vrot.lane.b32.xlu0 %v53_v0, %s1511_s30  ;;  %648 = vrot.lane.b32.xlu1 %v54_v2, %s1511_s30 }
  0x35   :  { %1274 = vmatmul.mubr.msk.f32.gmra.mxu0 %vm69_vm0, %v60_v11 }
  0x36   :  { %1276 = vmatprep.mubr.msk.f32.mxu0 %vm69_vm0, %v1585_v12  ;;  %1309 = vmatpush3.msra.mxu0 %v1572_v9 }
  0x38   :  { %455 = vrot.lane.b32.xlu0 %v1548_v1, %s1510_s1  ;;  %457 = vrot.lane.b32.xlu1 %v56_v3, %s1510_s1 }
  0x39   :  { %1277 = vmatmul.mubr.msk.f32.gmra.mxu0 %vm69_vm0, %v62_v13 }
  0x3c   :  { %650 = vrot.lane.b32.xlu0 %v1548_v1, %s1511_s30  ;;  %652 = vrot.lane.b32.xlu1 %v56_v3, %s1511_s30 }
  0x40   :  { %459 = vrot.lane.b32.xlu0 %v57_v6, %s1510_s1  ;;  %461 = vrot.lane.b32.xlu1 %v58_v7, %s1510_s1 }
  0x44   :  { %654 = vrot.lane.b32.xlu0 %v57_v6, %s1511_s30  ;;  %656 = vrot.lane.b32.xlu1 %v58_v7, %s1511_s30 }
  0x48   :  { %463 = vrot.lane.b32.xlu0 %v1574_v10, %s1510_s1  ;;  %465 = vrot.lane.b32.xlu1 %v60_v11, %s1510_s1 }
  0x4c   :  { %658 = vrot.lane.b32.xlu0 %v1574_v10, %s1511_s30  ;;  %660 = vrot.lane.b32.xlu1 %v60_v11, %s1511_s30 }
  0x50   :  { %467 = vrot.lane.b32.xlu0 %v1585_v12, %s1510_s1  ;;  %469 = vrot.lane.b32.xlu1 %v62_v13, %s1510_s1 }
  0x54   :  { %662 = vrot.lane.b32.xlu0 %v1585_v12, %s1511_s30  ;;  %664 = vrot.lane.b32.xlu1 %v62_v13, %s1511_s30 }
  0x8e   :  { %v257_v14 = vpop.permute.xlu0 %256  ;;  %v261_v15 = vpop.permute.xlu1 %260 }
  0x8f   :  { %1287 = vmatprep.mubr.msk.f32.mxu1 %vm69_vm0, %v257_v14 }
  0x92   :  { %v259_v16 = vpop.permute.xlu0 %258  ;;  %v263_v17 = vpop.permute.xlu1 %262 }
  0x93   :  { %1288 = vmatmul.mubr.msk.f32.vlgmr.msra.gmra.mxu1 %vm69_vm0, %v259_v16 }
  0x94   :  { %1290 = vmatprep.mubr.msk.f32.mxu1 %vm69_vm0, %v261_v15  ;;  %1326 = vmatpush3.msra.mxu1 %v1554_v4 }
  0x95   :  { %1327 = vmatprep.subr.mxu1 %v1557_v5 }
  0x96   :  { %v265_v18 = vpop.permute.xlu0 %264  ;;  %v267_v19 = vpop.permute.xlu1 %266  ;;  %1328 = vmatpush3.msra.mxu1 %v1557_v5 }
  0x97   :  { %1291 = vmatmul.mubr.msk.f32.gmra.mxu1 %vm69_vm0, %v263_v17  ;;  %1329 = vmatprep.subr.mxu1 %v1565_v8 }
  0x98   :  { %1293 = vmatprep.mubr.msk.f32.mxu1 %vm69_vm0, %v265_v18  ;;  %1330 = vmatpush3.msra.mxu1 %v1565_v8 }
  0x99   :  { %1331 = vmatprep.subr.mxu1 %v1572_v9 }
  0x9a   :  { %v269_v20 = vpop.permute.xlu0 %268  ;;  %v271_v21 = vpop.permute.xlu1 %270  ;;  %1332 = vmatpush3.msra.mxu1 %v1572_v9 }
  0x9b   :  { %1294 = vmatmul.mubr.msk.f32.gmra.mxu1 %vm69_vm0, %v267_v19 }
  0x9c   :  { %1296 = vmatprep.mubr.msk.f32.mxu1 %vm69_vm0, %v269_v20 }
  0x9e   :  { %v273_v22 = vpop.permute.xlu0 %272  ;;  %v275_v23 = vpop.permute.xlu1 %274 }
  0x9f   :  { %1297 = vmatmul.mubr.msk.f32.gmra.mxu1 %vm69_vm0, %v271_v21 }
  0xa0   :  { %1299 = vmatprep.mubr.msk.f32.mxu1 %vm69_vm0, %v273_v22 }
  0xa2   :  { %v452_v24 = vpop.permute.xlu0 %451  ;;  %v454_v25 = vpop.permute.xlu1 %453 }
  0xa3   :  { %1300 = vmatmul.mubr.msk.f32.gmra.mxu1 %vm69_vm0, %v275_v23  ;;  %1310 = vmatprep.mubr.msk.f32.mxu0 %vm69_vm0, %v452_v24 }
  0xa4   :  { %1311 = vmatmul.mubr.msk.f32.vlgmr.msra.gmra.mxu0 %vm69_vm0, %v454_v25 }
  0xa6   :  { %v647_v26 = vpop.permute.xlu0 %646  ;;  %v649_v27 = vpop.permute.xlu1 %648 }
  0xa7   :  { %1333 = vmatprep.mubr.msk.f32.mxu1 %vm69_vm0, %v647_v26 }
  0xa8   :  { %1334 = vmatmul.mubr.msk.f32.vlgmr.msra.gmra.mxu1 %vm69_vm0, %v649_v27 }
  0xaa   :  { %v456_v28 = vpop.permute.xlu0 %455  ;;  %v458_v29 = vpop.permute.xlu1 %457 }
  0xab   :  { %1313 = vmatprep.mubr.msk.f32.mxu0 %vm69_vm0, %v456_v28 }
  0xac   :  { %1314 = vmatmul.mubr.msk.f32.gmra.mxu0 %vm69_vm0, %v458_v29 }
  0xae   :  { %v651_v30 = vpop.permute.xlu0 %650  ;;  %v653_v31 = vpop.permute.xlu1 %652 }
  0xaf   :  { %1336 = vmatprep.mubr.msk.f32.mxu1 %vm69_vm0, %v651_v30 }
  0xb0   :  { %1337 = vmatmul.mubr.msk.f32.gmra.mxu1 %vm69_vm0, %v653_v31 }
  0xb2   :  { %v460_v32 = vpop.permute.xlu0 %459  ;;  %v462_v33 = vpop.permute.xlu1 %461 }
  0xb3   :  { %1316 = vmatprep.mubr.msk.f32.mxu0 %vm69_vm0, %v460_v32 }
  0xb4   :  { %1317 = vmatmul.mubr.msk.f32.gmra.mxu0 %vm69_vm0, %v462_v33 }
  0xb6   :  { %v655_v34 = vpop.permute.xlu0 %654  ;;  %v657_v35 = vpop.permute.xlu1 %656 }
  0xb7   :  { %1339 = vmatprep.mubr.msk.f32.mxu1 %vm69_vm0, %v655_v34 }
  0xb8   :  { %1340 = vmatmul.mubr.msk.f32.gmra.mxu1 %vm69_vm0, %v657_v35 }
  0xba   :  { %v464_v36 = vpop.permute.xlu0 %463  ;;  %v466_v37 = vpop.permute.xlu1 %465 }
  0xbb   :  { %1319 = vmatprep.mubr.msk.f32.mxu0 %vm69_vm0, %v464_v36 }
  0xbc   :  { %1320 = vmatmul.mubr.msk.f32.gmra.mxu0 %vm69_vm0, %v466_v37 }
  0xbe   :  { %v659_v38 = vpop.permute.xlu0 %658  ;;  %v661_v39 = vpop.permute.xlu1 %660 }
  0xbf   :  { %1342 = vmatprep.mubr.msk.f32.mxu1 %vm69_vm0, %v659_v38 }
  0xc0   :  { %1343 = vmatmul.mubr.msk.f32.gmra.mxu1 %vm69_vm0, %v661_v39 }
  0xc2   :  { %v468_v40 = vpop.permute.xlu0 %467  ;;  %v470_v41 = vpop.permute.xlu1 %469 }
  0xc3   :  { %1322 = vmatprep.mubr.msk.f32.mxu0 %vm69_vm0, %v468_v40 }
  0xc4   :  { %1323 = vmatmul.mubr.msk.f32.gmra.mxu0 %vm69_vm0, %v470_v41 }
  0xc6   :  { %v663_v42 = vpop.permute.xlu0 %662  ;;  %v665_v43 = vpop.permute.xlu1 %664 }
  0xc7   :  { %1345 = vmatprep.mubr.msk.f32.mxu1 %vm69_vm0, %v663_v42 }
  0xc8   :  { %1346 = vmatmul.mubr.msk.f32.gmra.mxu1 %vm69_vm0, %v665_v43 }
  0xe9   :  { %v1266_v44 = vpop.f32.mrf.mxu0 }
  0xea   :  { %v172_v47 = vadd.f32 %v1266_v44, %v1679_v46 }
  0xeb   :  { %v166_v45 = vpop.f32.mrf.mxu0 }
  0xec   :  { %v167_v49 = vadd.f32 %v1679_v46, %v166_v45  ;;  %1367 = vtanh.f32 %v172_v47 }
  0xed   :  { %v1269_v48 = vpop.f32.mrf.mxu0 }
  0xee   :  { %1369 = vtanh.f32 %v167_v49  ;;  %v182_v53 = vadd.f32 %v1269_v48, %v1679_v46 }
  0xef   :  { %v176_v50 = vpop.f32.mrf.mxu0 }
  0xf0   :  { %v177_v51 = vadd.f32 %v1679_v46, %v176_v50 }
  0xf1   :  { %v1272_v52 = vpop.f32.mrf.mxu0 }
  0xf2   :  { %1371 = vtanh.f32 %v177_v51  ;;  %v192_v58 = vadd.f32 %v1272_v52, %v1679_v46 }
  0xf3   :  { %v186_v54 = vpop.f32.mrf.mxu0  ;;  %1373 = vtanh.f32 %v182_v53 }
  0xf4   :  { %v187_v55 = vadd.f32 %v1679_v46, %v186_v54 }
  0xf5   :  { %v1275_v56 = vpop.f32.mrf.mxu0 }
  0xf6   :  { %1375 = vtanh.f32 %v187_v55  ;;  %v202_v4 = vadd.f32 %v1275_v56, %v1679_v46 }
  0xf7   :  { %v196_v60 = vpop.f32.mrf.mxu0  ;;  %1377 = vtanh.f32 %v192_v58 }
  0xf8   :  { %v197_v63 = vadd.f32 %v1679_v46, %v196_v60 }
  0xf9   :  { %v1368_v57 = vpop.eup %1367  ;;  %v1278_v2 = vpop.f32.mrf.mxu0 }
  0xfa   :  { %v226_v61 = vsel %vm69_vm0, %v1368_v57, 0.0  ;;  %1379 = vtanh.f32 %v197_v63  ;;  %v212_v15 = vadd.f32 %v1278_v2, %v1679_v46 }
  0xfb   :  { %v1370_v59 = vpop.eup %1369  ;;  %v206_v7 = vpop.f32.mrf.mxu0  ;;  %1381 = vtanh.f32 %v202_v4 }
  0xfc   :  { %v225_v62 = vsel %vm69_vm0, %v1370_v59, 0.0  ;;  %v207_v9 = vadd.f32 %v1679_v46, %v206_v7 }
  0xfd   :  { %v227_v1 = vadd.f32 %v226_v61, %v225_v62 }
  0xfe   :  { %1383 = vtanh.f32 %v207_v9 }
  0xff   :  { %v1372_v0 = vpop.eup %1371  ;;  %1385 = vtanh.f32 %v212_v15 }
 0x100   :  { %v228_v3 = vsel %vm69_vm0, %v1372_v0, 0.0  ;;  %v1374_v5 = vpop.eup %1373 }
 0x101   :  { %v229_v6 = vadd.f32 %v228_v3, %v227_v1  ;;  %v230_v8 = vsel %vm69_vm0, %v1374_v5, 0.0 }
 0x103   :  { %v1376_v11 = vpop.eup %1375  ;;  %v231_v13 = vadd.f32 %v230_v8, %v229_v6 }
 0x104   :  { %v232_v14 = vsel %vm69_vm0, %v1376_v11, 0.0  ;;  %v1378_v16 = vpop.eup %1377 }
 0x105   :  { %v233_v19 = vadd.f32 %v232_v14, %v231_v13  ;;  %v234_v21 = vsel %vm69_vm0, %v1378_v16, 0.0 }
 0x107   :  { %v1380_v22 = vpop.eup %1379  ;;  %v235_v26 = vadd.f32 %v234_v21, %v233_v19 }
 0x108   :  { %v236_v28 = vsel %vm69_vm0, %v1380_v22, 0.0  ;;  %v1382_v29 = vpop.eup %1381 }
 0x109   :  { %v237_v33 = vadd.f32 %v236_v28, %v235_v26  ;;  %v238_v34 = vsel %vm69_vm0, %v1382_v29, 0.0 }
 0x10b   :  { %v1384_v36 = vpop.eup %1383  ;;  %v239_v40 = vadd.f32 %v238_v34, %v237_v33 }
 0x10c   :  { %v240_v42 = vsel %vm69_vm0, %v1384_v36, 0.0  ;;  %v1386_v43 = vpop.eup %1385 }
 0x10d   :  { %v241_v49 = vadd.f32 %v240_v42, %v239_v40  ;;  %v242_v52 = vsel %vm69_vm0, %v1386_v43, 0.0 }
 0x10f   :  { %v243_v58 = vadd.f32 %v242_v52, %v241_v49 }
 0x111   :  { %v244_v4 = vrot.slane %v243_v58, 4 }
 0x113   :  { %v245_v19 = vadd.f32 %v244_v4, %v243_v58 }
 0x153   :  { %v1289_v17 = vpop.f32.mrf.mxu1 }
 0x154   :  { %v368_v18 = vadd.f32 %v1289_v17, %v1679_v46 }
 0x155   :  { %v362_v20 = vpop.f32.mrf.mxu1 }
 0x156   :  { %v363_v23 = vadd.f32 %v1679_v46, %v362_v20  ;;  %1387 = vtanh.f32 %v368_v18 }
 0x157   :  { %v1292_v24 = vpop.f32.mrf.mxu1 }
 0x158   :  { %1389 = vtanh.f32 %v363_v23  ;;  %v378_v25 = vadd.f32 %v1292_v24, %v1679_v46 }
 0x159   :  { %v372_v27 = vpop.f32.mrf.mxu1 }
 0x15a   :  { %v373_v30 = vadd.f32 %v1679_v46, %v372_v27  ;;  %1391 = vtanh.f32 %v378_v25 }
 0x15b   :  { %v1295_v31 = vpop.f32.mrf.mxu1 }
 0x15c   :  { %1393 = vtanh.f32 %v373_v30  ;;  %v388_v32 = vadd.f32 %v1295_v31, %v1679_v46 }
 0x15d   :  { %v382_v35 = vpop.f32.mrf.mxu1 }
 0x15e   :  { %v383_v37 = vadd.f32 %v1679_v46, %v382_v35  ;;  %1395 = vtanh.f32 %v388_v32  ;;  %v246_v32 = vrot.slane %v245_v19, 2 }
 0x15f   :  { %v1298_v38 = vpop.f32.mrf.mxu1 }
 0x160   :  { %1397 = vtanh.f32 %v383_v37  ;;  %v398_v39 = vadd.f32 %v1298_v38, %v1679_v46  ;;  %v247_v42 = vadd.f32 %v246_v32, %v245_v19 }
 0x161   :  { %v392_v41 = vpop.f32.mrf.mxu1 }
 0x162   :  { %v393_v44 = vadd.f32 %v1679_v46, %v392_v41  ;;  %1399 = vtanh.f32 %v398_v39 }
 0x163   :  { %v1301_v45 = vpop.f32.mrf.mxu1  ;;  %v1388_v47 = vpop.eup %1387 }
 0x164   :  { %1401 = vtanh.f32 %v393_v44  ;;  %v408_v48 = vadd.f32 %v1301_v45, %v1679_v46  ;;  %v1312_v54 = vpop.f32.mrf.mxu0  ;;  %v422_v57 = vsel %vm69_vm0, %v1388_v47, 0.0 }
 0x165   :  { %v1390_v50 = vpop.eup %1389  ;;  %v402_v51 = vpop.f32.mrf.mxu1  ;;  %v563_v9 = vadd.f32 %v1312_v54, %v1679_v46 }
 0x166   :  { %v421_v53 = vsel %vm69_vm0, %v1390_v50, 0.0  ;;  %v403_v55 = vadd.f32 %v1679_v46, %v402_v51  ;;  %1403 = vtanh.f32 %v408_v48  ;;  %v557_v62 = vpop.f32.mrf.mxu0  ;;  %v248_v50 = vrot.slane %v247_v42, 1 }
 0x167   :  { %v1392_v56 = vpop.eup %1391  ;;  %v423_v60 = vadd.f32 %v422_v57, %v421_v53  ;;  %v558_v7 = vadd.f32 %v1679_v46, %v557_v62 }
 0x168   :  { %1405 = vtanh.f32 %v403_v55  ;;  %v1335_v63 = vpop.f32.mrf.mxu1  ;;  %v426_v2 = vsel %vm69_vm0, %v1392_v56, 0.0 }
 0x169   :  { %v1394_v59 = vpop.eup %1393  ;;  %1407 = vtanh.f32 %v558_v7  ;;  %v758_v24 = vadd.f32 %v1335_v63, %v1679_v46 }
 0x16a   :  { %v424_v61 = vsel %vm69_vm0, %v1394_v59, 0.0  ;;  %v752_v11 = vpop.f32.mrf.mxu1  ;;  %1409 = vtanh.f32 %v563_v9 }
 0x16b   :  { %v425_v0 = vadd.f32 %v424_v61, %v423_v60  ;;  %v1396_v1 = vpop.eup %1395  ;;  %v753_v22 = vadd.f32 %v1679_v46, %v752_v11  ;;  %v249_v61 = vadd.f32 %v248_v50, %v247_v42 }
 0x16c   :  { %v1315_v3 = vpop.f32.mrf.mxu0  ;;  %v430_v17 = vsel %vm69_vm0, %v1396_v1, 0.0 }
 0x16d   :  { %v1398_v5 = vpop.eup %1397  ;;  %v427_v6 = vadd.f32 %v426_v2, %v425_v0  ;;  %v573_v30 = vadd.f32 %v1315_v3, %v1679_v46 }
 0x16e   :  { %v428_v8 = vsel %vm69_vm0, %v1398_v5, 0.0  ;;  %v567_v13 = vpop.f32.mrf.mxu0 }
 0x16f   :  { %v429_v14 = vadd.f32 %v428_v8, %v427_v6  ;;  %v568_v15 = vadd.f32 %v1679_v46, %v567_v13  ;;  %v1400_v16 = vpop.eup %1399  ;;  %v250_v13 = vmul.f32 0.0125, %v249_v61 }
 0x170   :  { %v1338_v18 = vpop.f32.mrf.mxu1  ;;  %v434_v29 = vsel %vm69_vm0, %v1400_v16, 0.0 }
 0x171   :  { %v1402_v20 = vpop.eup %1401  ;;  %v431_v21 = vadd.f32 %v430_v17, %v429_v14  ;;  %1411 = vtanh.f32 %v568_v15  ;;  %v768_v39 = vadd.f32 %v1338_v18, %v1679_v46 }
 0x172   :  { %v432_v23 = vsel %vm69_vm0, %v1402_v20, 0.0  ;;  %v762_v25 = vpop.f32.mrf.mxu1  ;;  %1413 = vtanh.f32 %v753_v22  ;;  %v1746_v22 = vld [vmem:[%s1923_s3] sm:$0x1] }
 0x173   :  { %v433_v26 = vadd.f32 %v432_v23, %v431_v21  ;;  %v763_v27 = vadd.f32 %v1679_v46, %v762_v25  ;;  %v1404_v28 = vpop.eup %1403  ;;  %1415 = vtanh.f32 %v758_v24 }
 0x174   :  { %v1318_v31 = vpop.f32.mrf.mxu0  ;;  %v438_v41 = vsel %vm69_vm0, %v1404_v28, 0.0 }
 0x175   :  { %v1406_v33 = vpop.eup %1405  ;;  %v435_v34 = vadd.f32 %v434_v29, %v433_v26  ;;  %1417 = vtanh.f32 %v763_v27  ;;  %v583_v45 = vadd.f32 %v1318_v31, %v1679_v46  ;;  %v251_v29 = vmul.f32 %v250_v13, %v1746_v22 }
 0x176   :  { %v577_v35 = vpop.f32.mrf.mxu0  ;;  %v436_v36 = vsel %vm69_vm0, %v1406_v33, 0.0  ;;  %1419 = vtanh.f32 %v573_v30  ;;  %v1408_v52 = vpop.eup %1407 }
 0x177   :  { %v578_v37 = vadd.f32 %v1679_v46, %v577_v35  ;;  %v437_v38 = vadd.f32 %v436_v36, %v435_v34  ;;  %v1410_v55 = vpop.eup %1409  ;;  %v616_v62 = vsel %vm69_vm0, %v1408_v52, 0.0 }
 0x178   :  { %v1341_v40 = vpop.f32.mrf.mxu1  ;;  %v617_v1 = vsel %vm69_vm0, %v1410_v55, 0.0 }
 0x179   :  { %1421 = vtanh.f32 %v578_v37  ;;  %v439_v43 = vadd.f32 %v438_v41, %v437_v38  ;;  %v778_v53 = vadd.f32 %v1341_v40, %v1679_v46  ;;  %v618_v9 = vadd.f32 %v617_v1, %v616_v62 }
 0x17a   :  { %v772_v44 = vpop.f32.mrf.mxu1  ;;  %1423 = vtanh.f32 %v768_v39 }
 0x17b   :  { %v773_v47 = vadd.f32 %v1679_v46, %v772_v44  ;;  %v440_v48 = vrot.slane %v439_v43, 4  ;;  %v253_v44 = vsel %vm252_vm1, %v251_v29, 0.0 }
 0x17c   :  { %v1321_v49 = vpop.f32.mrf.mxu0 }
 0x17d   :  { %1425 = vtanh.f32 %v773_v47  ;;  %v441_v51 = vadd.f32 %v440_v48, %v439_v43  ;;  %v593_v59 = vadd.f32 %v1321_v49, %v1679_v46 }
 0x17e   :  { %v587_v54 = vpop.f32.mrf.mxu0  ;;  %1427 = vtanh.f32 %v583_v45  ;;  %v1412_v58 = vpop.eup %1411 }
 0x17f   :  { %v588_v56 = vadd.f32 %v1679_v46, %v587_v54  ;;  %v442_v57 = vrot.slane %v441_v51, 2  ;;  %v1414_v0 = vpop.eup %1413  ;;  %v619_v4 = vsel %vm69_vm0, %v1412_v58, 0.0 }
 0x180   :  { %v1344_v60 = vpop.f32.mrf.mxu1  ;;  %v1416_v3 = vpop.eup %1415  ;;  %v811_v15 = vsel %vm69_vm0, %v1414_v0, 0.0  ;;  %v620_v20 = vadd.f32 %v619_v4, %v618_v9 }
 0x181   :  { %1429 = vtanh.f32 %v588_v56  ;;  %v443_v63 = vadd.f32 %v442_v57, %v441_v51  ;;  %v788_v5 = vadd.f32 %v1344_v60, %v1679_v46  ;;  %v812_v19 = vsel %vm69_vm0, %v1416_v3, 0.0 }
 0x182   :  { %1431 = vtanh.f32 %v778_v53  ;;  %v782_v2 = vpop.f32.mrf.mxu1  ;;  %v1418_v8 = vpop.eup %1417  ;;  %v813_v26 = vadd.f32 %v812_v19, %v811_v15 }
 0x183   :  { %v783_v6 = vadd.f32 %v1679_v46, %v782_v2  ;;  %v444_v7 = vrot.slane %v443_v63, 1  ;;  %1433 = vtanh.f32 %v593_v59  ;;  %v1420_v14 = vpop.eup %1419  ;;  %v814_v23 = vsel %vm69_vm0, %v1418_v8, 0.0 }
 0x184   :  { %v1324_v11 = vpop.f32.mrf.mxu0  ;;  %v621_v27 = vsel %vm69_vm0, %v1420_v14, 0.0  ;;  %v815_v35 = vadd.f32 %v814_v23, %v813_v26 }
 0x185   :  { %1435 = vtanh.f32 %v783_v6  ;;  %v603_v16 = vadd.f32 %v1324_v11, %v1679_v46  ;;  %v445_v17 = vadd.f32 %v444_v7, %v443_v63  ;;  %v622_v36 = vadd.f32 %v621_v27, %v620_v20 }
 0x186   :  { %v1422_v18 = vpop.eup %1421  ;;  %v597_v21 = vpop.f32.mrf.mxu0  ;;  %1437 = vtanh.f32 %v788_v5 }
 0x187   :  { %v598_v24 = vadd.f32 %v1679_v46, %v597_v21  ;;  %v446_v25 = vmul.f32 0.0125, %v445_v17  ;;  %1439 = vtanh.f32 %v603_v16  ;;  %v1424_v30 = vpop.eup %1423  ;;  %v623_v31 = vsel %vm69_vm0, %v1422_v18, 0.0 }
 0x188   :  { %v1347_v28 = vpop.f32.mrf.mxu1  ;;  %v624_v41 = vadd.f32 %v623_v31, %v622_v36  ;;  %v816_v42 = vsel %vm69_vm0, %v1424_v30, 0.0 }
 0x189   :  { %1441 = vtanh.f32 %v598_v24  ;;  %v798_v32 = vadd.f32 %v1347_v28, %v1679_v46  ;;  %v447_v33 = vmul.f32 %v446_v25, %v1746_v22  ;;  %v817_v47 = vadd.f32 %v816_v42, %v815_v35 }
 0x18a   :  { %v1426_v34 = vpop.eup %1425  ;;  %v792_v37 = vpop.f32.mrf.mxu1 }
 0x18b   :  { %v793_v38 = vadd.f32 %v1679_v46, %v792_v37  ;;  %v448_v39 = vsel %vm252_vm1, %v447_v33, 0.0  ;;  %v1428_v40 = vpop.eup %1427  ;;  %1443 = vtanh.f32 %v798_v32  ;;  %v818_v43 = vsel %vm69_vm0, %v1426_v34, 0.0 }
 0x18c   :  { %449 = vadd.xlane.f32.xlu0 %v448_v39  ;;  %v625_v49 = vsel %vm69_vm0, %v1428_v40, 0.0  ;;  %v819_v50 = vadd.f32 %v818_v43, %v817_v47 }
 0x18d   :  { %1445 = vtanh.f32 %v793_v38  ;;  %v626_v51 = vadd.f32 %v625_v49, %v624_v41 }
 0x18e   :  { %v1430_v45 = vpop.eup %1429 }
 0x18f   :  { %v1432_v48 = vpop.eup %1431  ;;  %v627_v46 = vsel %vm69_vm0, %v1430_v45, 0.0 }
 0x190   :  { %254 = vadd.xlane.f32.xlu0 %v253_v44  ;;  %v1434_v52 = vpop.eup %1433  ;;  %v628_v54 = vadd.f32 %v627_v46, %v626_v51  ;;  %v820_v55 = vsel %vm69_vm0, %v1432_v48, 0.0 }
 0x191   :  { %v821_v58 = vadd.f32 %v820_v55, %v819_v50  ;;  %v629_v60 = vsel %vm69_vm0, %v1434_v52, 0.0 }
 0x192   :  { %v1436_v53 = vpop.eup %1435  ;;  %v630_v63 = vadd.f32 %v629_v60, %v628_v54 }
 0x193   :  { %v822_v56 = vsel %vm69_vm0, %v1436_v53, 0.0  ;;  %v1438_v57 = vpop.eup %1437 }
 0x194   :  { %v1440_v59 = vpop.eup %1439  ;;  %v823_v62 = vadd.f32 %v822_v56, %v821_v58  ;;  %v824_v3 = vsel %vm69_vm0, %v1438_v57, 0.0 }
 0x195   :  { %v633_v4 = vsel %vm69_vm0, %v1440_v59, 0.0 }
 0x196   :  { %v1442_v61 = vpop.eup %1441  ;;  %v825_v7 = vadd.f32 %v824_v3, %v823_v62 }
 0x197   :  { %v631_v0 = vsel %vm69_vm0, %v1442_v61, 0.0 }
 0x198   :  { %v632_v1 = vadd.f32 %v631_v0, %v630_v63  ;;  %v1444_v2 = vpop.eup %1443  ;;  %v885_v63 = vlaneseq }
 0x199   :  { %v828_v13 = vsel %vm69_vm0, %v1444_v2, 0.0 }
 0x19a   :  { %v1446_v5 = vpop.eup %1445  ;;  %v634_v6 = vadd.f32 %v633_v4, %v632_v1  ;;  %v886_v0 = vshrl.u32 %v885_v63, 7 }
 0x19b   :  { %v826_v8 = vsel %vm69_vm0, %v1446_v5, 0.0 }
 0x19c   :  { %v635_v9 = vrot.slane %v634_v6, 4  ;;  %v827_v11 = vadd.f32 %v826_v8, %v825_v7  ;;  %vm920_vm6 = vcmp.eq.s32.totalorder %v886_v0, 1  ;;  %vm887_vm7 = vcmp.eq.s32.totalorder %v886_v0, 0 }
 0x19d   :  { %vm1066_vm8 = vcmp.eq.s32.totalorder %v886_v0, 3  ;;  %vm993_vm9 = vcmp.eq.s32.totalorder %v886_v0, 2  ;;  %v1831_v0 = vld [vmem:[#allocation2 + $0x30] sm:$0xff] }
 0x19e   :  { %v636_v14 = vadd.f32 %v635_v9, %v634_v6  ;;  %v829_v15 = vadd.f32 %v828_v13, %v827_v11 }
 0x1a0   :  { %v637_v16 = vrot.slane %v636_v14, 2  ;;  %v830_v17 = vrot.slane %v829_v15, 4 }
 0x1a2   :  { %v638_v18 = vadd.f32 %v637_v16, %v636_v14  ;;  %v831_v19 = vadd.f32 %v830_v17, %v829_v15 }
 0x1a4   :  { %v639_v20 = vrot.slane %v638_v18, 1  ;;  %v832_v21 = vrot.slane %v831_v19, 2 }
 0x1a6   :  { %v640_v23 = vadd.f32 %v639_v20, %v638_v18  ;;  %v833_v24 = vadd.f32 %v832_v21, %v831_v19 }
 0x1a8   :  { %v641_v25 = vmul.f32 0.0125, %v640_v23  ;;  %v834_v26 = vrot.slane %v833_v24, 1 }
 0x1aa   :  { %v642_v27 = vmul.f32 %v641_v25, %v1746_v22  ;;  %v835_v28 = vadd.f32 %v834_v26, %v833_v24 }
 0x1ac   :  { %v643_v29 = vsel %vm252_vm1, %v642_v27, 0.0  ;;  %v836_v30 = vmul.f32 0.0125, %v835_v28 }
 0x1ad   :  { %644 = vadd.xlane.f32.xlu1 %v643_v29 }
 0x1ae   :  { %v837_v31 = vmul.f32 %v836_v30, %v1746_v22 }
 0x1b0   :  { %v838_v32 = vsel %vm252_vm1, %v837_v31, 0.0 }
 0x1b1   :  { %839 = vadd.xlane.f32.xlu0 %v838_v32 }
 0x215   :  { %v450_v33 = vpop.xlane.xlu0 %449 }
 0x216   :  { %v842_v37 = vrot.slane %v450_v33, 7 }
 0x219   :  { %v255_v34 = vpop.xlane.xlu0 %254 }
 0x21a   :  { %v851_v39 = vsel %vm850_vm2, %v255_v34, %v842_v37 }
 0x236   :  { %v645_v35 = vpop.xlane.xlu1 %644 }
 0x237   :  { %v845_v36 = vrot.slane %v645_v35, 6 }
 0x239   :  { %v853_v41 = vsel %vm852_vm3, %v851_v39, %v845_v36 }
 0x23a   :  { %v840_v38 = vpop.xlane.xlu0 %839 }
 0x23b   :  { %v848_v40 = vrot.slane %v840_v38, 5 }
 0x23d   :  { %v855_v42 = vsel %vm854_vm4, %v853_v41, %v848_v40 }
 0x23e   :  { %v857_v43 = vsel %vm856_vm5, %v855_v42, -inf }
 0x23f   :  { %858 = vmax.xlane.f32.xlu1 %v857_v43  ;;  %v1786_v43 = vld [vmem:[#allocation2 + $0x8] sm:$0xff] }
 0x2c8   :  { %v859_v22 = vpop.xlane.xlu1 %858 }
 0x2c9   :  { %v860_v44 = vrot.slane %v859_v22, 4 }
 0x2cb   :  { %v861_v45 = vmax.f32 %v859_v22, %v860_v44  ;;  %v1789_v44 = vld [vmem:[#allocation2] sm:$0xff] }
 0x2cd   :  { %v862_v47 = vrot.slane %v861_v45, 2 }
 0x2cf   :  { %v863_v48 = vmax.f32 %v861_v45, %v862_v47  ;;  %v1794_v47 = vld [vmem:[#allocation2 + $0x20] sm:$0xff] }
 0x2d1   :  { %v864_v49 = vrot.slane %v863_v48, 1 }
 0x2d3   :  { %v865_v46 = vmax.f32 %v863_v48, %v864_v49  ;;  %v1797_v49 = vld [vmem:[#allocation2 + $0x10] sm:$0xff] }
 0x2d5   :  { %1348 = vpush %v865_v46 }
 0x306   :  { %s1349_s3 = spop %1348 }
 0x307   :  { %v867_v50 = vstv %s1349_s3 }
 0x308   :  { %v868_v51 = vsub.f32 %v855_v42, %v867_v50 }
 0x30a   :  { %v869_v52 = vmul.f32 1.442695, %v868_v51  ;;  %v1803_v51 = vld [vmem:[#allocation2 + $0x18] sm:$0xff] }
 0x30c   :  { %1447 = vpow2.f32 %v869_v52 }
 0x319   :  { %v1448_v53 = vpop.eup %1447 }
 0x31a   :  { %v871_v54 = vsel %vm856_vm5, %v1448_v53, 0.0 }
 0x31b   :  { %872 = vadd.xlane.f32.xlu0 %v871_v54  ;;  %v1809_v54 = vld [vmem:[#allocation2 + $0x28] sm:$0xff] }
 0x3a4   :  { %v873_v55 = vpop.xlane.xlu0 %872 }
 0x3a5   :  { %v874_v56 = vrot.slane %v873_v55, 4 }
 0x3a7   :  { %v875_v57 = vadd.f32 %v874_v56, %v873_v55 }
 0x3a9   :  { %v876_v58 = vrot.slane %v875_v57, 2 }
 0x3ab   :  { %v877_v59 = vadd.f32 %v876_v58, %v875_v57 }
 0x3ad   :  { %v878_v60 = vrot.slane %v877_v59, 1 }
 0x3af   :  { %v879_v61 = vadd.f32 %v878_v60, %v877_v59 }
 0x3b1   :  { %1350 = vpush %v879_v61 }
 0x3e2   :  { %s1351_s9 = spop %1350 }
 0x3e3   :  { %v881_v62 = vstv %s1351_s9 }
 0x3e4   :  { %1449 = vrcp.f32 %v881_v62 }
 0x3f1   :  { %v1450_v1 = vpop.eup %1449 }
 0x3f2   :  { %v883_v2 = vmul.f32 %v1450_v1, %v1448_v53 }
 0x3f4   :  { %v921_v3 = vsel %vm920_vm6, %v883_v2, 0.0  ;;  %884 = vst.msk [vmem:[%s1925_s5] sm:$0xf] %vm856_vm5, %v883_v2  ;;  %v888_v4 = vsel %vm887_vm7, %v883_v2, 0.0  ;;  %v1067_v7 = vsel %vm1066_vm8, %v883_v2, 0.0  ;;  %v994_v8 = vsel %vm993_vm9, %v883_v2, 0.0 }
 0x3f5   :  { %v922_v5 = vsel %vm856_vm5, %v921_v3, 0.0  ;;  %v889_v6 = vsel %vm856_vm5, %v888_v4, 0.0  ;;  %v1068_v9 = vsel %vm856_vm5, %v1067_v7, 0.0  ;;  %v995_v11 = vsel %vm856_vm5, %v994_v8, 0.0  ;;  %v1837_v3 = vld [vmem:[#allocation2 + $0x40] sm:$0xff] }
 0x3f6   :  { %923 = vadd.xlane.f32.xlu0 %v922_v5  ;;  %890 = vadd.xlane.f32.xlu1 %v889_v6 }
 0x3fa   :  { %1069 = vadd.xlane.f32.xlu0 %v1068_v9  ;;  %996 = vadd.xlane.f32.xlu1 %v995_v11 }
 0x47f   :  { %v924_v13 = vpop.xlane.xlu0 %923  ;;  %v891_v14 = vpop.xlane.xlu1 %890 }
 0x480   :  { %v925_v15 = vrot.slane %v924_v13, 4  ;;  %v892_v16 = vrot.slane %v891_v14, 4 }
 0x482   :  { %v926_v17 = vadd.f32 %v925_v15, %v924_v13  ;;  %v893_v18 = vadd.f32 %v892_v16, %v891_v14 }
 0x483   :  { %v1070_v19 = vpop.xlane.xlu0 %1069  ;;  %v997_v20 = vpop.xlane.xlu1 %996 }
 0x484   :  { %v927_v21 = vrot.slane %v926_v17, 2  ;;  %v894_v23 = vrot.slane %v893_v18, 2  ;;  %v1071_v24 = vrot.slane %v1070_v19, 4  ;;  %v998_v25 = vrot.slane %v997_v20, 4 }
 0x486   :  { %v1072_v26 = vadd.f32 %v1071_v24, %v1070_v19  ;;  %v999_v27 = vadd.f32 %v998_v25, %v997_v20  ;;  %v895_v28 = vadd.f32 %v894_v23, %v893_v18  ;;  %v928_v29 = vadd.f32 %v927_v21, %v926_v17 }
 0x488   :  { %v1073_v30 = vrot.slane %v1072_v26, 2  ;;  %v1000_v31 = vrot.slane %v999_v27, 2  ;;  %v896_v32 = vrot.slane %v895_v28, 1  ;;  %v929_v33 = vrot.slane %v928_v29, 1 }
 0x48a   :  { %v897_v34 = vadd.f32 %v896_v32, %v895_v28  ;;  %v930_v35 = vadd.f32 %v929_v33, %v928_v29  ;;  %v1001_v36 = vadd.f32 %v1000_v31, %v999_v27  ;;  %v1074_v37 = vadd.f32 %v1073_v30, %v1072_v26 }
 0x48c   :  { %1352 = vpush %v897_v34  ;;  %v1002_v38 = vrot.slane %v1001_v36, 1  ;;  %v1075_v39 = vrot.slane %v1074_v37, 1 }
 0x48d   :  { %1354 = vpush %v930_v35 }
 0x48e   :  { %v1003_v40 = vadd.f32 %v1002_v38, %v1001_v36  ;;  %v1076_v41 = vadd.f32 %v1075_v39, %v1074_v37 }
 0x490   :  { %1356 = vpush %v1003_v40 }
 0x491   :  { %1358 = vpush %v1076_v41 }
 0x4bd   :  { %s1784_s5 = spop %1352 }
 0x4be   :  { %s1355_s12 = spop %1354  ;;  %v909_v35 = vstv %s1784_s5 }
 0x4bf   :  { %v932_v42 = vstv %s1355_s12  ;;  %v910_v38 = vmul.f32 %v1789_v44, %v909_v35 }
 0x4c0   :  { %v934_v22 = vmul.f32 %v1786_v43, %v932_v42  ;;  %v933_v45 = vmul.f32 %v1789_v44, %v932_v42  ;;  %v937_v48 = vmul.f32 %v1794_v47, %v932_v42  ;;  %v935_v46 = vmul.f32 %v1797_v49, %v932_v42 }
 0x4c1   :  { %v939_v50 = vmul.f32 %v932_v42, %v1574_v10  ;;  %v936_v52 = vmul.f32 %v1803_v51, %v932_v42  ;;  %s1357_s13 = spop %1356  ;;  %v941_v53 = vmul.f32 %v932_v42, %v1585_v12  ;;  %v938_v55 = vmul.f32 %v1809_v54, %v932_v42  ;;  %v1814_v10 = vld [vmem:[#allocation2 + $0x38] sm:$0xff]  ;;  %v1820_v12 = vld [vmem:[#allocation2 + $0x48] sm:$0xff] }
 0x4c2   :  { %955 = vrot.lane.b32.xlu0 %v934_v22, %s1509_s0  ;;  %953 = vrot.lane.b32.xlu1 %v933_v45, %s1509_s0  ;;  %v1005_v56 = vstv %s1357_s13  ;;  %v940_v57 = vmul.f32 %v1814_v10, %v932_v42  ;;  %v942_v59 = vmul.f32 %v1820_v12, %v932_v42  ;;  %s1359_s14 = spop %1358  ;;  %v912_v42 = vmul.f32 %v1797_v49, %v909_v35 }
 0x4c3   :  { %v1006_v58 = vmul.f32 %v1789_v44, %v1005_v56  ;;  %v1008_v60 = vmul.f32 %v1797_v49, %v1005_v56  ;;  %v1007_v61 = vmul.f32 %v1786_v43, %v1005_v56  ;;  %v1010_v62 = vmul.f32 %v1794_v47, %v1005_v56 }
 0x4c4   :  { %v1009_v63 = vmul.f32 %v1803_v51, %v1005_v56  ;;  %v1012_v1 = vmul.f32 %v1831_v0, %v1005_v56  ;;  %v1011_v2 = vmul.f32 %v1809_v54, %v1005_v56  ;;  %v1014_v4 = vmul.f32 %v1837_v3, %v1005_v56 }
 0x4c5   :  { %v1078_v5 = vstv %s1359_s14  ;;  %v1013_v6 = vmul.f32 %v1814_v10, %v1005_v56  ;;  %v1015_v8 = vmul.f32 %v1820_v12, %v1005_v56 }
 0x4c6   :  { %961 = vrot.lane.b32.xlu0 %v937_v48, %s1509_s0  ;;  %957 = vrot.lane.b32.xlu1 %v935_v46, %s1509_s0  ;;  %v1079_v7 = vmul.f32 %v1789_v44, %v1078_v5  ;;  %v1081_v9 = vmul.f32 %v1797_v49, %v1078_v5  ;;  %v1080_v11 = vmul.f32 %v1786_v43, %v1078_v5 }
 0x4c7   :  { %v1083_v13 = vmul.f32 %v1794_v47, %v1078_v5  ;;  %v1082_v14 = vmul.f32 %v1803_v51, %v1078_v5  ;;  %v1085_v15 = vmul.f32 %v1831_v0, %v1078_v5  ;;  %v1084_v16 = vmul.f32 %v1809_v54, %v1078_v5 }
 0x4c8   :  { %v1087_v17 = vmul.f32 %v1837_v3, %v1078_v5  ;;  %v1086_v18 = vmul.f32 %v1814_v10, %v1078_v5  ;;  %v1088_v19 = vmul.f32 %v1820_v12, %v1078_v5  ;;  %v918_v5 = vmul.f32 %v1837_v3, %v909_v35 }
 0x4ca   :  { %965 = vrot.lane.b32.xlu0 %v939_v50, %s1509_s0  ;;  %959 = vrot.lane.b32.xlu1 %v936_v52, %s1509_s0  ;;  %v911_v52 = vmul.f32 %v1786_v43, %v909_v35 }
 0x4ce   :  { %969 = vrot.lane.b32.xlu0 %v941_v53, %s1509_s0  ;;  %963 = vrot.lane.b32.xlu1 %v938_v55, %s1509_s0  ;;  %v914_v53 = vmul.f32 %v1794_v47, %v909_v35 }
 0x4d2   :  { %967 = vrot.lane.b32.xlu1 %v940_v57, %s1509_s0  ;;  %1026 = vrot.lane.b32.xlu0 %v1006_v58, %s1510_s1 }
 0x4d6   :  { %971 = vrot.lane.b32.xlu1 %v942_v59, %s1509_s0  ;;  %1030 = vrot.lane.b32.xlu0 %v1008_v60, %s1510_s1  ;;  %v916_v59 = vmul.f32 %v1831_v0, %v909_v35  ;;  %v913_v60 = vmul.f32 %v1803_v51, %v909_v35 }
 0x4da   :  { %1028 = vrot.lane.b32.xlu1 %v1007_v61, %s1510_s1  ;;  %1034 = vrot.lane.b32.xlu0 %v1010_v62, %s1510_s1 }
 0x4de   :  { %1032 = vrot.lane.b32.xlu1 %v1009_v63, %s1510_s1  ;;  %1038 = vrot.lane.b32.xlu0 %v1012_v1, %s1510_s1 }
 0x4e2   :  { %1036 = vrot.lane.b32.xlu1 %v1011_v2, %s1510_s1  ;;  %1042 = vrot.lane.b32.xlu0 %v1014_v4, %s1510_s1 }
 0x4e6   :  { %1040 = vrot.lane.b32.xlu1 %v1013_v6, %s1510_s1  ;;  %1099 = vrot.lane.b32.xlu0 %v1079_v7, %s1511_s30  ;;  %v915_v6 = vmul.f32 %v1809_v54, %v909_v35  ;;  %v917_v54 = vmul.f32 %v1814_v10, %v909_v35 }
 0x4ea   :  { %1044 = vrot.lane.b32.xlu1 %v1015_v8, %s1510_s1  ;;  %1103 = vrot.lane.b32.xlu0 %v1081_v9, %s1511_s30 }
 0x4ee   :  { %1101 = vrot.lane.b32.xlu1 %v1080_v11, %s1511_s30  ;;  %1107 = vrot.lane.b32.xlu0 %v1083_v13, %s1511_s30 }
 0x4f2   :  { %1105 = vrot.lane.b32.xlu1 %v1082_v14, %s1511_s30  ;;  %1111 = vrot.lane.b32.xlu0 %v1085_v15, %s1511_s30 }
 0x4f6   :  { %1109 = vrot.lane.b32.xlu1 %v1084_v16, %s1511_s30  ;;  %1115 = vrot.lane.b32.xlu0 %v1087_v17, %s1511_s30 }
 0x4fa   :  { %1113 = vrot.lane.b32.xlu1 %v1086_v18, %s1511_s30 }
 0x4fe   :  { %1117 = vrot.lane.b32.xlu1 %v1088_v19, %s1511_s30 }
 0x534   :  { %v956_v20 = vpop.permute.xlu0 %955  ;;  %v954_v21 = vpop.permute.xlu1 %953 }
 0x535   :  { %v983_v41 = vadd.f32 %v954_v21, %v910_v38  ;;  %v984_v57 = vadd.f32 %v956_v20, %v911_v52  ;;  %v919_v21 = vmul.f32 %v1820_v12, %v909_v35 }
 0x538   :  { %v962_v23 = vpop.permute.xlu0 %961  ;;  %v958_v24 = vpop.permute.xlu1 %957 }
 0x539   :  { %v985_v46 = vadd.f32 %v958_v24, %v912_v42  ;;  %v987_v58 = vadd.f32 %v962_v23, %v914_v53 }
 0x53c   :  { %v966_v25 = vpop.permute.xlu0 %965  ;;  %v960_v26 = vpop.permute.xlu1 %959 }
 0x53d   :  { %v989_v63 = vadd.f32 %v966_v25, %v916_v59  ;;  %v986_v1 = vadd.f32 %v960_v26, %v913_v60 }
 0x540   :  { %v970_v27 = vpop.permute.xlu0 %969  ;;  %v964_v28 = vpop.permute.xlu1 %963 }
 0x541   :  { %v991_v9 = vadd.f32 %v970_v27, %v918_v5  ;;  %v988_v11 = vadd.f32 %v964_v28, %v915_v6 }
 0x544   :  { %v1027_v29 = vpop.permute.xlu0 %1026  ;;  %v968_v30 = vpop.permute.xlu1 %967 }
 0x545   :  { %v1056_v22 = vadd.f32 %v1027_v29, %v983_v41  ;;  %v990_v18 = vadd.f32 %v968_v30, %v917_v54 }
 0x548   :  { %v1031_v31 = vpop.permute.xlu0 %1030  ;;  %v1866_v32 = vpop.permute.xlu1 %971 }
 0x549   :  { %v1058_v55 = vadd.f32 %v1031_v31, %v985_v46  ;;  %v992_v24 = vadd.f32 %v1866_v32, %v919_v21 }
 0x54c   :  { %v1035_v33 = vpop.permute.xlu0 %1034  ;;  %v1029_v34 = vpop.permute.xlu1 %1028 }
 0x54d   :  { %v1060_v61 = vadd.f32 %v1035_v33, %v987_v58  ;;  %v1057_v62 = vadd.f32 %v1029_v34, %v984_v57 }
 0x550   :  { %v1039_v36 = vpop.permute.xlu0 %1038  ;;  %v1033_v37 = vpop.permute.xlu1 %1032 }
 0x551   :  { %v1062_v0 = vadd.f32 %v1039_v36, %v989_v63  ;;  %v1059_v7 = vadd.f32 %v1033_v37, %v986_v1 }
 0x554   :  { %v1043_v39 = vpop.permute.xlu0 %1042  ;;  %v1037_v40 = vpop.permute.xlu1 %1036 }
 0x555   :  { %v1064_v14 = vadd.f32 %v1043_v39, %v991_v9  ;;  %v1061_v15 = vadd.f32 %v1037_v40, %v988_v11 }
 0x558   :  { %v1100_v45 = vpop.permute.xlu0 %1099  ;;  %v1041_v48 = vpop.permute.xlu1 %1040 }
 0x559   :  { %v1129_v50 = vadd.f32 %v1100_v45, %v1056_v22  ;;  %v1063_v10 = vadd.f32 %v1041_v48, %v990_v18 }
 0x55b   :  { %1139 = vst.msk [vmem:[%s1924_s4] sm:$0xff] %vm69_vm0, %v1129_v50 }
 0x55c   :  { %v1104_v44 = vpop.permute.xlu0 %1103  ;;  %v1045_v56 = vpop.permute.xlu1 %1044 }
 0x55d   :  { %v1131_v49 = vadd.f32 %v1104_v44, %v1058_v55  ;;  %v1065_v26 = vadd.f32 %v1045_v56, %v992_v24 }
 0x55f   :  { %1141 = vst.msk [vmem:[%s1924_s4 + $0x10] sm:$0xff] %vm69_vm0, %v1131_v49 }
 0x560   :  { %v1108_v43 = vpop.permute.xlu0 %1107  ;;  %v1102_v47 = vpop.permute.xlu1 %1101 }
 0x561   :  { %v1133_v2 = vadd.f32 %v1108_v43, %v1060_v61  ;;  %v1130_v4 = vadd.f32 %v1102_v47, %v1057_v62 }
 0x563   :  { %1143 = vst.msk [vmem:[%s1924_s4 + $0x20] sm:$0xff] %vm69_vm0, %v1133_v2  ;;  %1140 = vst.msk [vmem:[%s1924_s4 + $0x8] sm:$0xff] %vm69_vm0, %v1130_v4 }
 0x564   :  { %v1112_v51 = vpop.permute.xlu0 %1111  ;;  %v1106_v8 = vpop.permute.xlu1 %1105 }
 0x565   :  { %v1135_v13 = vadd.f32 %v1112_v51, %v1062_v0  ;;  %v1132_v3 = vadd.f32 %v1106_v8, %v1059_v7 }
 0x567   :  { %1145 = vst.msk [vmem:[%s1924_s4 + $0x30] sm:$0xff] %vm69_vm0, %v1135_v13  ;;  %1142 = vst.msk [vmem:[%s1924_s4 + $0x18] sm:$0xff] %vm69_vm0, %v1132_v3 }
 0x568   :  { %v1116_v16 = vpop.permute.xlu0 %1115  ;;  %v1110_v17 = vpop.permute.xlu1 %1109 }
 0x569   :  { %v1137_v19 = vadd.f32 %v1116_v16, %v1064_v14  ;;  %v1134_v20 = vadd.f32 %v1110_v17, %v1061_v15 }
 0x56b   :  { %1147 = vst.msk [vmem:[%s1924_s4 + $0x40] sm:$0xff] %vm69_vm0, %v1137_v19  ;;  %1144 = vst.msk [vmem:[%s1924_s4 + $0x28] sm:$0xff] %vm69_vm0, %v1134_v20 }
 0x56c   :  { %v1114_v23 = vpop.permute.xlu1 %1113 }
 0x56d   :  { %v1136_v25 = vadd.f32 %v1114_v23, %v1063_v10 }
 0x56f   :  { %1146 = vst.msk [vmem:[%s1924_s4 + $0x38] sm:$0xff] %vm69_vm0, %v1136_v25 }
 0x570   :  { %v1118_v12 = vpop.permute.xlu1 %1117 }
 0x571   :  { %v1138_v27 = vadd.f32 %v1118_v12, %v1065_v26 }
 0x573   :  { %1148 = vst.msk [vmem:[%s1924_s4 + $0x48] sm:$0xff] %vm69_vm0, %v1138_v27 }
 0x574   :  { %1157 = vsyncpa [#allocation3], 1 }
 0x575   :  { %1158 = vsyncpa [#allocation5], 1 }

</bundles_post_ra>
